<compile_context>
chip_gen: v7x
topology: tpu7x:2x2x1
jax: 0.10.0
libtpu: 0.0.40
codegen_flags: <defaults>
</compile_context>

<pallas_src>
import math

import jax
import jax.numpy as jnp
from jax.experimental import pallas as pl
from jax.experimental.pallas import tpu as pltpu

_LANE = 128          # lane width: feature dims padded to this
_SUBLANE_BF16 = 16   # per-graph node-slot granularity (bf16 sublane packing)
_TARGET_ROWS = 256   # matmul M per grid step (fills v6e/v7x 256-wide MXU)


def _cdiv(a, b):
    return -(-a // b)


def _round_up(x, m):
    return _cdiv(x, m) * m


def _pad_to(a, shape):
    return jnp.pad(a, [(0, s - d) for d, s in zip(a.shape, shape)])


# ---------------------------------------------------------------------------
# Pallas kernel: one *pack* of G block-diagonal graphs per grid step.
# Everything is VMEM-resident; the kernel is three MXU matmuls + bias/ReLU.
# ---------------------------------------------------------------------------
def _wlconv_kernel(adj_ref, x_ref, w1_ref, b1_ref, w2_ref, b2_ref, out_ref):
    # gcn = (0.5*I + 0.5*diag(1/deg)*A) @ x  -- mean-normalization, the 0.5
    # factor and the self term are pre-folded into adj by the wrapper.
    gcn = jnp.dot(adj_ref[...], x_ref[...], preferred_element_type=jnp.float32)
    # MLP: Linear -> ReLU -> Linear (bf16 MXU operands, f32 accumulation)
    h1 = jnp.dot(gcn.astype(jnp.bfloat16), w1_ref[...],
                 preferred_element_type=jnp.float32) + b1_ref[...]
    h1 = jnp.maximum(h1, 0.0)
    out = jnp.dot(h1.astype(jnp.bfloat16), w2_ref[...],
                  preferred_element_type=jnp.float32) + b2_ref[...]
    out_ref[...] = out.astype(out_ref.dtype)


def wlconv_pallas(adj, x, w1, b1, w2, b2):
    """adj [B,P,P] bf16 (block-diag, normalization pre-folded), x [B,P,Cp] bf16,
    w1 [Cp,Hp] bf16, b1 [1,Hp] f32, w2 [Hp,Op] bf16, b2 [1,Op] f32."""
    num_packs, p_rows, _ = adj.shape
    c_p = x.shape[-1]
    h_p = w1.shape[-1]
    o_p = w2.shape[-1]

    # one pack of graphs per grid step (leading dim squeezed out of the refs)
    def per_pack(*shape):
        return pl.BlockSpec((None,) + shape,
                            lambda b, _n=len(shape): (b,) + (0,) * _n)

    # weights / biases: same single block every step
    def shared(*shape):
        return pl.BlockSpec(shape, lambda b, _n=len(shape): (0,) * _n)

    flops = 2 * num_packs * p_rows * (p_rows * c_p + c_p * h_p + h_p * o_p)
    bytes_accessed = sum(math.prod(a.shape) * a.dtype.itemsize
                         for a in (adj, x, w1, b1, w2, b2))
    bytes_accessed += num_packs * p_rows * o_p * 2          # bf16 output

    # explicit VMEM budget (v5e default scoped limit is only 16 MiB; v7x has
    # 64 MiB physical) -- derived from the actual block footprint.
    blk = 2 * 2 * (p_rows * p_rows + p_rows * c_p + p_rows * o_p)   # dbl-buf I/O, bf16
    blk += 2 * (2 * (c_p * h_p + h_p * o_p) + 4 * (h_p + o_p))      # weights/biases
    blk += 4 * p_rows * (c_p + h_p + o_p)                           # f32 intermediates
    vmem_limit = int(min(64 * 2**20, max(4 * blk, 16 * 2**20)))

    return pl.pallas_call(
        _wlconv_kernel,
        out_shape=jax.ShapeDtypeStruct((num_packs, p_rows, o_p), jnp.bfloat16),
        grid=(num_packs,),
        in_specs=[
            per_pack(p_rows, p_rows),   # adj (block-diagonal, pre-scaled)
            per_pack(p_rows, c_p),      # x
            shared(c_p, h_p),           # w1
            shared(1, h_p),             # b1
            shared(h_p, o_p),           # w2
            shared(1, o_p),             # b2
        ],
        out_specs=per_pack(p_rows, o_p),
        compiler_params=pltpu.CompilerParams(
            dimension_semantics=("parallel",),
            vmem_limit_bytes=vmem_limit),
        cost_estimate=pl.CostEstimate(flops=flops, transcendentals=0,
                                      bytes_accessed=bytes_accessed),
    )(adj, x, w1, b1, w2, b2)


# ---------------------------------------------------------------------------
# Glue (plain XLA): scatter-add the edge lists of one *pack* of graphs
# straight into the padded [P,P] block-diagonal adjacency, fold the mean
# normalization, the 0.5 factor and the 0.5*I self term, and cast to bf16 --
# a single fused N^2 materialization.  (Edge-list scatter has no
# rectangular-tile Pallas form, so it stays in XLA.)
# ---------------------------------------------------------------------------
def _build_pack_adj(edge_index, edge_attr, n_p, p_rows):
    """edge_index [G,2,E] int32, edge_attr [G,E] -> scaled bf16 adj [P,P]."""
    g = edge_index.shape[0]
    off = (jnp.arange(g, dtype=edge_index.dtype) * n_p)[:, None]
    src = (edge_index[:, 0] + off).reshape(-1)
    dst = (edge_index[:, 1] + off).reshape(-1)
    w = edge_attr.reshape(-1).astype(jnp.float32)
    adj = jnp.zeros((p_rows, p_rows), jnp.float32).at[dst, src].add(w)
    deg = jnp.zeros((p_rows,), jnp.float32).at[dst].add(1.0)     # |N(i)| (per message)
    scale = jnp.where(deg > 0.0, 0.5 / jnp.maximum(deg, 1.0), 0.0)
    adj = adj * scale[:, None] + 0.5 * jnp.eye(p_rows, dtype=jnp.float32)
    return adj.astype(jnp.bfloat16)


# Parameter init (PyTorch-Linear-style uniform(-1/sqrt(fan_in), 1/sqrt(fan_in)))
def init_params(key, c_in, c_out):
    k1, k2, k3, k4 = jax.random.split(key, 4)
    hid = 2 * c_out
    lim1 = 1.0 / math.sqrt(c_in)
    lim2 = 1.0 / math.sqrt(hid)
    w1 = jax.random.uniform(k1, (c_in, hid), jnp.float32, -lim1, lim1)
    b1 = jax.random.uniform(k2, (1, hid), jnp.float32, -lim1, lim1)
    w2 = jax.random.uniform(k3, (hid, c_out), jnp.float32, -lim2, lim2)
    b2 = jax.random.uniform(k4, (1, c_out), jnp.float32, -lim2, lim2)
    return w1, b1, w2, b2


def wlconv_forward_batched(node_feats, edge_index, edge_attr, params):
    """node_feats [B,N,c_in], edge_index [B,2,E] int32, edge_attr [B,E] or None."""
    w1, b1, w2, b2 = params
    b_graphs, n, c_in = node_feats.shape
    e = edge_index.shape[-1]
    hid, c_out = w1.shape[1], w2.shape[1]
    if edge_attr is None:
        edge_attr = jnp.ones((b_graphs, e), jnp.float32)

    # feature dims -> lane-dense (128); per-graph node slot -> bf16 sublane (16)
    n_p = _round_up(n, _SUBLANE_BF16)
    c_p = _round_up(c_in, _LANE)
    h_p = _round_up(hid, _LANE)
    o_p = _round_up(c_out, _LANE)

    # pack G graphs per grid step so every matmul sees >= _TARGET_ROWS rows;
    # p_rows (adj side length / matmul M and K) is also kept lane-dense.
    g_per_pack = max(1, _cdiv(_TARGET_ROWS, n_p))
    num_packs = max(1, _cdiv(b_graphs, g_per_pack))
    b_pad = num_packs * g_per_pack
    p_rows = _round_up(g_per_pack * n_p, _LANE)

    def pad_batch(a):
        return jnp.pad(a, [(0, b_pad - b_graphs)] + [(0, 0)] * (a.ndim - 1))

    node_feats = pad_batch(node_feats.astype(jnp.float32))
    edge_index = pad_batch(edge_index)
    edge_attr = pad_batch(edge_attr.astype(jnp.float32))

    # node features: pad nodes/channels, pack G graphs into P rows per step
    x = _pad_to(node_feats, (b_pad, n_p, c_p))
    x = x.reshape(num_packs, g_per_pack * n_p, c_p)
    x = _pad_to(x, (num_packs, p_rows, c_p)).astype(jnp.bfloat16)

    # block-diagonal pre-scaled adjacency per pack
    ei = edge_index.reshape(num_packs, g_per_pack, 2, e)
    ea = edge_attr.reshape(num_packs, g_per_pack, e)
    adj = jax.vmap(lambda i, a: _build_pack_adj(i, a, n_p, p_rows))(ei, ea)

    w1_p = _pad_to(w1, (c_p, h_p)).astype(jnp.bfloat16)
    b1_p = _pad_to(b1, (1, h_p))
    w2_p = _pad_to(w2, (h_p, o_p)).astype(jnp.bfloat16)
    b2_p = _pad_to(b2, (1, o_p))

    out_p = wlconv_pallas(adj, x, w1_p, b1_p, w2_p, b2_p)    # [packs,P,Op] bf16
    out = out_p[:, :g_per_pack * n_p].reshape(b_pad, n_p, o_p)
    return out[:b_graphs, :n, :c_out].astype(jnp.float32)


def wlconv_forward(node_feats, edge_index, edge_attr, params):
    """Single-graph forward matching the PyTorch module's signature."""
    ea = None if edge_attr is None else edge_attr[None]
    return wlconv_forward_batched(node_feats[None], edge_index[None], ea,
                                  params)[0]


# Pure-f32 JAX reference (single graph) for the semantics check.
def wlconv_ref(node_feats, edge_index, edge_attr, params):
    w1, b1, w2, b2 = params
    n = node_feats.shape[0]
    src, dst = edge_index[0], edge_index[1]
    w = edge_attr.reshape(-1).astype(jnp.float32)
    adj = jnp.zeros((n, n), jnp.float32).at[dst, src].add(w)
    deg = jnp.zeros((n,), jnp.float32).at[dst].add(1.0)
    inv_deg = jnp.where(deg > 0.0, 1.0 / jnp.maximum(deg, 1.0), 0.0)
    agg = (adj @ node_feats) * inv_deg[:, None]
    h = 0.5 * (node_feats + agg)
    h1 = jnp.maximum(h @ w1 + b1, 0.0)
    return h1 @ w2 + b2


if __name__ == "__main__":
    key = jax.random.PRNGKey(0)
    k_x, k_e, k_w, k_p = jax.random.split(key, 4)

    # 32 graphs of 16 nodes -> 16 graphs packed per step, grid=(2,) (even, so
    # v7x's two TensorCores both get a step), 256-row matmuls per step.
    B, N, E = 32, 16, 32
    c_in, c_out = 8, 8

    node_feats = jax.random.normal(k_x, (B, N, c_in), jnp.float32)
    edge_index = jax.random.randint(k_e, (B, 2, E), 0, N, jnp.int32)
    edge_attr = jax.random.uniform(k_w, (B, E), jnp.float32)

    params = init_params(k_p, c_in, c_out)

    out = wlconv_forward_batched(node_feats, edge_index, edge_attr, params)
    out = jax.block_until_ready(out)
    assert out.shape == (B, N, c_out)

    ref = jax.vmap(lambda x, ei, ea: wlconv_ref(x, ei, ea, params))(
        node_feats, edge_index, edge_attr)
    # adj/x/weights go through the MXU as bf16 (f32 accumulation) and the
    # kernel stores bf16, so tolerance vs. the pure-f32 reference is loosened.
    assert jnp.allclose(out, ref, atol=5e-2, rtol=5e-2), float(
        jnp.max(jnp.abs(out - ref)))

    print("KERNEL_OK")
</pallas_src>

<mosaic_0001>
module attributes {stable_mosaic.version = 11 : i64} {
  func.func @_wlconv_kernel(%arg0: i32, %arg1: memref<1x256x256xbf16, #tpu.memory_space<vmem>>, %arg2: memref<1x256x128xbf16, #tpu.memory_space<vmem>>, %arg3: memref<128x128xbf16, #tpu.memory_space<vmem>>, %arg4: memref<1x128xf32, #tpu.memory_space<vmem>>, %arg5: memref<128x128xbf16, #tpu.memory_space<vmem>>, %arg6: memref<1x128xf32, #tpu.memory_space<vmem>>, %arg7: memref<1x256x128xbf16, #tpu.memory_space<vmem>>) attributes {dimension_semantics = [#tpu.dimension_semantics<parallel>], iteration_bounds = array<i64: 2>, scalar_prefetch = 0 : i64, scratch_operands = 0 : i64, tpu.core_type = #tpu.core_type<tc>, window_params = [{transform_indices = @transform_0, window_bounds = array<i64: 1, 256, 256>}, {transform_indices = @transform_1, window_bounds = array<i64: 1, 256, 128>}, {pipeline_mode = #tpu.pipeline_mode<synchronous>, transform_indices = @transform_2, window_bounds = array<i64: 128, 128>}, {pipeline_mode = #tpu.pipeline_mode<synchronous>, transform_indices = @transform_3, window_bounds = array<i64: 1, 128>}, {pipeline_mode = #tpu.pipeline_mode<synchronous>, transform_indices = @transform_4, window_bounds = array<i64: 128, 128>}, {pipeline_mode = #tpu.pipeline_mode<synchronous>, transform_indices = @transform_5, window_bounds = array<i64: 1, 128>}, {transform_indices = @transform_6, window_bounds = array<i64: 1, 256, 128>}]} {
    %c0 = arith.constant 0 : index
    %c0_0 = arith.constant 0 : index
    %c0_1 = arith.constant 0 : index
    %0 = vector.load %arg1[%c0, %c0_0, %c0_1] : memref<1x256x256xbf16, #tpu.memory_space<vmem>>, vector<1x256x256xbf16>
    %1 = vector.shape_cast %0 : vector<1x256x256xbf16> to vector<256x256xbf16>
    %c0_2 = arith.constant 0 : index
    %c0_3 = arith.constant 0 : index
    %c0_4 = arith.constant 0 : index
    %2 = vector.load %arg2[%c0_2, %c0_3, %c0_4] : memref<1x256x128xbf16, #tpu.memory_space<vmem>>, vector<1x256x128xbf16>
    %3 = vector.shape_cast %2 : vector<1x256x128xbf16> to vector<256x128xbf16>
    %cst = arith.constant dense<0.000000e+00> : vector<256x128xf32>
    %4 = tpu.matmul %1, %3, %cst {dimension_numbers = #tpu.dot_dimension_numbers<[1], [0], [0], [1], [0, 0, 1, 1], [], []>} : vector<256x256xbf16>, vector<256x128xbf16>, vector<256x128xf32> -> vector<256x128xf32>
    %5 = arith.truncf %4 : vector<256x128xf32> to vector<256x128xbf16>
    %c0_5 = arith.constant 0 : index
    %c0_6 = arith.constant 0 : index
    %6 = vector.load %arg3[%c0_5, %c0_6] : memref<128x128xbf16, #tpu.memory_space<vmem>>, vector<128x128xbf16>
    %cst_7 = arith.constant dense<0.000000e+00> : vector<256x128xf32>
    %7 = tpu.matmul %5, %6, %cst_7 {dimension_numbers = #tpu.dot_dimension_numbers<[1], [0], [0], [1], [0, 0, 1, 1], [], []>} : vector<256x128xbf16>, vector<128x128xbf16>, vector<256x128xf32> -> vector<256x128xf32>
    %c0_8 = arith.constant 0 : index
    %c0_9 = arith.constant 0 : index
    %8 = vector.load %arg4[%c0_8, %c0_9] : memref<1x128xf32, #tpu.memory_space<vmem>>, vector<1x128xf32>
    %9 = vector.broadcast %8 : vector<1x128xf32> to vector<256x128xf32>
    %10 = arith.addf %7, %9 : vector<256x128xf32>
    %cst_10 = arith.constant 0.000000e+00 : f32
    %11 = vector.broadcast %cst_10 : f32 to vector<256x128xf32>
    %12 = arith.maximumf %10, %11 : vector<256x128xf32>
    %13 = arith.truncf %12 : vector<256x128xf32> to vector<256x128xbf16>
    %c0_11 = arith.constant 0 : index
    %c0_12 = arith.constant 0 : index
    %14 = vector.load %arg5[%c0_11, %c0_12] : memref<128x128xbf16, #tpu.memory_space<vmem>>, vector<128x128xbf16>
    %cst_13 = arith.constant dense<0.000000e+00> : vector<256x128xf32>
    %15 = tpu.matmul %13, %14, %cst_13 {dimension_numbers = #tpu.dot_dimension_numbers<[1], [0], [0], [1], [0, 0, 1, 1], [], []>} : vector<256x128xbf16>, vector<128x128xbf16>, vector<256x128xf32> -> vector<256x128xf32>
    %c0_14 = arith.constant 0 : index
    %c0_15 = arith.constant 0 : index
    %16 = vector.load %arg6[%c0_14, %c0_15] : memref<1x128xf32, #tpu.memory_space<vmem>>, vector<1x128xf32>
    %17 = vector.broadcast %16 : vector<1x128xf32> to vector<256x128xf32>
    %18 = arith.addf %15, %17 : vector<256x128xf32>
    %19 = arith.truncf %18 : vector<256x128xf32> to vector<256x128xbf16>
    %c0_16 = arith.constant 0 : index
    %c0_17 = arith.constant 0 : index
    %c0_18 = arith.constant 0 : index
    %20 = vector.load %arg7[%c0_16, %c0_17, %c0_18] : memref<1x256x128xbf16, #tpu.memory_space<vmem>>, vector<1x256x128xbf16>
    %21 = vector.shape_cast %20 : vector<1x256x128xbf16> to vector<256x128xbf16>
    %22 = vector.shape_cast %19 : vector<256x128xbf16> to vector<1x256x128xbf16>
    tpu.vector_store %arg7[%c0_16, %c0_17, %c0_18], %22 {strides = array<i32>} : memref<1x256x128xbf16, #tpu.memory_space<vmem>>, vector<1x256x128xbf16>,
    return
  }
  func.func @transform_0(%arg0: i32) -> (i32, i32, i32) {
    %c0_i32 = arith.constant 0 : i32
    %c0_i32_0 = arith.constant 0 : i32
    %c0_i32_1 = arith.constant 0 : i32
    return %arg0, %c0_i32, %c0_i32_0 : i32, i32, i32
  }
  func.func @transform_1(%arg0: i32) -> (i32, i32, i32) {
    %c0_i32 = arith.constant 0 : i32
    %c0_i32_0 = arith.constant 0 : i32
    %c0_i32_1 = arith.constant 0 : i32
    return %arg0, %c0_i32, %c0_i32_0 : i32, i32, i32
  }
  func.func @transform_2(%arg0: i32) -> (i32, i32) {
    %c0_i32 = arith.constant 0 : i32
    %c0_i32_0 = arith.constant 0 : i32
    %c0_i32_1 = arith.constant 0 : i32
    return %c0_i32, %c0_i32_0 : i32, i32
  }
  func.func @transform_3(%arg0: i32) -> (i32, i32) {
    %c0_i32 = arith.constant 0 : i32
    %c0_i32_0 = arith.constant 0 : i32
    %c0_i32_1 = arith.constant 0 : i32
    return %c0_i32, %c0_i32_0 : i32, i32
  }
  func.func @transform_4(%arg0: i32) -> (i32, i32) {
    %c0_i32 = arith.constant 0 : i32
    %c0_i32_0 = arith.constant 0 : i32
    %c0_i32_1 = arith.constant 0 : i32
    return %c0_i32, %c0_i32_0 : i32, i32
  }
  func.func @transform_5(%arg0: i32) -> (i32, i32) {
    %c0_i32 = arith.constant 0 : i32
    %c0_i32_0 = arith.constant 0 : i32
    %c0_i32_1 = arith.constant 0 : i32
    return %c0_i32, %c0_i32_0 : i32, i32
  }
  func.func @transform_6(%arg0: i32) -> (i32, i32, i32) {
    %c0_i32 = arith.constant 0 : i32
    %c0_i32_0 = arith.constant 0 : i32
    %c0_i32_1 = arith.constant 0 : i32
    return %arg0, %c0_i32, %c0_i32_0 : i32, i32, i32
  }
}

</mosaic_0001>

<bundles_post_ra>
// kernel: tpu_custom_call.1
= control target key start
LH: loop header
LB: loop body
LE: loop exit
PB: predicated region body
PF: predicated region fallthrough
CT: control target
= control target key end

     0   :  { %s2987_s0 = inlined_call_operand.hbm [shape: bf16[2,256,256], index: 0, kind: input, shape index: {}]   ;;  %s2988_s1 = inlined_call_operand.hbm [shape: bf16[2,256,128], index: 1, kind: input, shape index: {}]   ;;  %s2989_s2 = inlined_call_operand.hbm [shape: bf16[128,128], index: 2, kind: input, shape index: {}]   ;;  %s2990_s3 = inlined_call_operand.vmem [shape: f32[1,128], index: 3, kind: input, shape index: {}]   ;;  %s2991_s4 = inlined_call_operand.hbm [shape: bf16[128,128], index: 4, kind: input, shape index: {}]   ;;  %s2992_s5 = inlined_call_operand.vmem [shape: f32[1,128], index: 5, kind: input, shape index: {}]   ;;  %s2993_s6 = inlined_call_operand.hbm [shape: bf16[2,256,128], index: 6, kind: output, shape index: {}]  }
   0x1   :  { %2999 = sst [smem:[#allocation17_spill]] %s2987_s0 }
   0x2   :  { %3000 = sst [smem:[#allocation18_spill]] %s2989_s2 }
   0x3   :  { %3001 = sst [smem:[#allocation19_spill]] %s2991_s4 }
   0x4   :  { %11 = vsyncpa [#allocation3], 0 }
   0x5   :  { %13 = vsyncpa [#allocation3 + $0x1], 0 }
   0x6   :  { %14 = vsyncpa [#allocation6], 0 }
   0x7   :  { %16 = vsyncpa [#allocation6 + $0x1], 0 }
   0x8   :  { %17 = vsyncpa [#allocation9], 0 }
   0x9   :  { %18 = vsyncpa [#allocation4], 0 }
   0xa   :  { %20 = vsyncpa [#allocation4 + $0x1], 0  ;;  %s2544_s21 = smov 0   ;;  %s2546_s22 = smov 0  }
   0xb   :  { %s2548_s23 = smov 0   ;;  %s2550_s24 = smov 0  }
   0xc LB: > { %s2565_s25 = sadd.s32 4294967295, %s2496_s24   ;;  %s1638_s26 = sadd.s32 4294967294, %s2496_s24   ;;  %s2496_s24 = sphi %s2550_s24, %s3028_s24   ;;  %s2492_s23 = sphi %s2548_s23, %s3027_s23   ;;  %s2488_s22 = sphi %s2546_s22, %s3026_s22   ;;  %s2484_s21 = sphi %s2544_s21, %s3025_s21  }
   0xd   : > { %p46_p0 = scmp.ne.s32.totalorder %s2488_s22, %s2484_s21  ;;  %p2994_p1 = scmp.eq.s32.totalorder %s2565_s25, 0 }
   0xe   : > { %p186_p3 = scmp.eq.s32.totalorder %s1638_s26, 1  ;;  %p1639_p5 = scmp.ge.s32.totalorder %s2496_s24, 1 }
   0xf   : > { %p2574_p4 = por %p2994_p1, %p46_p0  ;;  %p193_p7 = scmp.lt.s32.totalorder %s2496_s24, 3 }
  0x10   : > { %p2579_p6 = por %p186_p3, %p46_p0  ;;  %s2498_s30 = smov [#allocation7]  }
  0x11   : > { %s3002_s27 = scalar_select %p2574_p4, 1, 0 }
  0x12   : > { %s3003_s28 = scalar_select %p2579_p6, 1, 0 }
  0x13   : > { %p2584_p8 = pnand %p1639_p5, %p193_p7  ;;  %s205_s7 = sshll.u32 %s2498_s30, 4  ;;  %s2588_s7 = int_to_ptr.vmem [resolvable:$true] %s205_s7 }
  0x14   : > { %s2499_s9 = smov [#allocation8]   ;;  %s3006_s2 = sld [smem:[#allocation18_spill]] }
  0x15   : > { %p2158_p9 = pneg %p2584_p8  ;;  %s221_s10 = sshll.u32 %s2499_s9, 4  ;;  %s2599_s10 = int_to_ptr.vmem [resolvable:$true] %s221_s10 }
  0x17   : > { %p2595_p11 = pnand %p2158_p9, %p2994_p1 }
  0x19   : > { %p2304_p13 = pneg %p2595_p11 }
  0x1a   : > { %s2302_s13 = scalar_lea.hbm %s3006_s2, 1024 }
  0x1b   : > { %p2303_p12 = scmp.ne.s32.totalorder %s3006_s2, %s2302_s13  ;;  %p2309_p5 = scmp.lt.u32.totalorder %s2302_s13, %s3006_s2 }
  0x1d   : > { %p2305_p0 = pnand %p2304_p13, %p2303_p12 }
  0x1f   : > { %p2306_p3 = pneg %p2305_p0 }
  0x21   : > { %p2311_p7 = pnand %p2309_p5, %p2306_p3 }
  0x23   : > { %2314 = shalt.err (!%p2311_p7)
}
  0x24   : > { %s2315_s18 = scalar_lea.vmem %s2588_s7, 1024  ;;  %p2323_p2 = scmp.lt.s32.totalorder %s2588_s7, %s2588_s7 }
  0x25   : > { %p2316_p9 = scmp.ne.s32.totalorder %s2588_s7, %s2315_s18  ;;  %p2324_p12 = scmp.lt.s32.totalorder %s2315_s18, %s2315_s18 }
  0x27   : > { %p2318_p10 = pnand %p2316_p9, %p2304_p13  ;;  %p2325_p0 = por %p2324_p12, %p2323_p2 }
  0x29   : > { %p2319_p1 = pneg %p2318_p10 }
  0x2b   : > { %p2326_p6 = pnand %p2325_p0, %p2319_p1 }
  0x2d   : > { %2329 = shalt.err (!%p2326_p6)
}
  0x2e   : > { %s2995_s19 = smov 64   ;;  %s2996_s20 = smov 4  }
  0x2f   : > { %2161 = dma.hbm_to_vmem [thread:$0]  (!%p2595_p11), %s3006_s2, 1024, %s2588_s7, [#allocation6], %s2995_s19, %s2995_s19, %s2996_s20  }
  0x30   : > { %s3007_s4 = sld [smem:[#allocation19_spill]] }
  0x36   : > { %s2330_s12 = scalar_lea.hbm %s3007_s4, 1024 }
  0x37   : > { %p2331_p1 = scmp.ne.s32.totalorder %s3007_s4, %s2330_s12  ;;  %p2337_p10 = scmp.lt.u32.totalorder %s2330_s12, %s3007_s4 }
  0x39   : > { %p2333_p2 = pnand %p2331_p1, %p2304_p13 }
  0x3b   : > { %p2334_p6 = pneg %p2333_p2 }
  0x3d   : > { %p2339_p3 = pnand %p2337_p10, %p2334_p6 }
  0x3f   : > { %2342 = shalt.err (!%p2339_p3)
}
  0x40   : > { %s2343_s7 = scalar_lea.vmem %s2599_s10, 1024  ;;  %p2351_p12 = scmp.lt.s32.totalorder %s2599_s10, %s2599_s10 }
  0x41   : > { %p2344_p5 = scmp.ne.s32.totalorder %s2599_s10, %s2343_s7  ;;  %p2352_p0 = scmp.lt.s32.totalorder %s2343_s7, %s2343_s7 }
  0x43   : > { %p2346_p7 = pnand %p2344_p5, %p2304_p13  ;;  %p2353_p1 = por %p2352_p0, %p2351_p12 }
  0x45   : > { %p2347_p9 = pneg %p2346_p7 }
  0x47   : > { %p2354_p2 = pnand %p2353_p1, %p2347_p9 }
  0x49   : > { %2357 = shalt.err (!%p2354_p2)
}
  0x4a   : > { %2164 = dma.hbm_to_vmem [thread:$0]  (!%p2595_p11), %s3007_s4, 1024, %s2599_s10, [#allocation9], %s2995_s19, %s2995_s19, %s2996_s20  }
  0x4b   : > { %s2660_s8 = sadd.s32 1, %s2496_s24   ;;  %s33_s26 = sadd.s32 1, %s2492_s23 }
  0x4c   : > { %s30_s30 = ssub.s32 %s2496_s24, %s2660_s8  ;;  %p40_p13 = scmp.ne.s32.totalorder %s2492_s23, %s2488_s22 }
  0x4d   : > { %p31_p6 = scmp.eq.s32.totalorder %s30_s30, 0  ;;  %p41_p10 = scmp.eq.s32.totalorder %s2496_s24, 0 }
  0x4e   : > { %p3008_p3 = scmp.eq.s32.totalorder %s2565_s25, 1  ;;  %p2178_p7 = scmp.lt.s32.totalorder %s2496_s24, 2 }
  0x4f   : > { %s2676_s11 = scalar_select %p31_p6, %s2492_s23, %s33_s26  }
  0x50   : > { %p2670_p5 = por %p3008_p3, %p40_p13  ;;  %p42_p9 = por %p41_p10, %p40_p13 }
  0x51   : > { %3010 = sst [smem:[#allocation16_spill]] %s2676_s11  ;;  %s2679_s12 = sand.u32 1, %s2492_s23  }
  0x52   : > { %s3009_s9 = scalar_select %p2670_p5, 1, 0 }
  0x53   : > { %s1643_s10 = sshll.u32 %s2679_s12, 8  ;;  %s1758_s13 = sshll.u32 %s2496_s24, 12 }
  0x54   : > { %s3011_s0 = sld [smem:[#allocation17_spill]]  ;;  %s242_s7 = scalar_lea.vmem [#allocation2], %s1643_s10 }
  0x55   : > { %s249_s17 = sshll.u32 %s242_s7, 4  ;;  %p2690_p11 = pnand %p2178_p7, %p42_p9  ;;  %s2688_s17 = int_to_ptr.vmem [resolvable:$true] %s249_s17 }
  0x56   : > { %s239_s30 = scalar_lea.sflag [#allocation3], %s2679_s12 }
  0x57   : > { %p2360_p0 = pneg %p2690_p11 }
  0x5a   : > { %s2686_s16 = scalar_lea.hbm %s3011_s0, %s1758_s13  ;;  %s2363_s14 = scalar_lea.hbm %s3011_s0, 8192 }
  0x5b   : > { %s2358_s19 = scalar_lea.hbm %s2686_s16, 4096  ;;  %p2364_p13 = scmp.lt.u32.totalorder %s2686_s16, %s3011_s0 }
  0x5c   : > { %p2359_p12 = scmp.ne.s32.totalorder %s2686_s16, %s2358_s19  ;;  %p2365_p6 = scmp.lt.u32.totalorder %s2363_s14, %s2358_s19 }
  0x5d   : > { %p2367_p3 = scmp.lt.u32.totalorder %s2358_s19, %s2686_s16 }
  0x5e   : > { %p2361_p1 = pnand %p2360_p0, %p2359_p12  ;;  %p2366_p10 = por %p2365_p6, %p2364_p13 }
  0x60   : > { %p2362_p2 = pneg %p2361_p1  ;;  %p2368_p7 = por %p2367_p3, %p2366_p10 }
  0x62   : > { %p2369_p9 = pnand %p2368_p7, %p2362_p2 }
  0x64   : > { %2372 = shalt.err (!%p2369_p9)
}
  0x65   : > { %s2373_s20 = scalar_lea.vmem %s2688_s17, 4096  ;;  %s2502_s10 = smov [#allocation2]  }
  0x66   : > { %p2374_p12 = scmp.ne.s32.totalorder %s2688_s17, %s2373_s20  ;;  %s2378_s13 = sshll.u32 %s2502_s10, 4  ;;  %s2379_s13 = int_to_ptr.vmem [resolvable:$false] %s2378_s13 }
  0x67   : > { %s2380_s15 = scalar_lea.vmem %s2379_s13, 8192  ;;  %p2381_p4 = scmp.lt.s32.totalorder %s2688_s17, %s2379_s13 }
  0x68   : > { %p2376_p1 = pnand %p2374_p12, %p2360_p0  ;;  %p2382_p13 = scmp.lt.s32.totalorder %s2380_s15, %s2373_s20 }
  0x6a   : > { %p2377_p5 = pneg %p2376_p1  ;;  %p2383_p6 = por %p2382_p13, %p2381_p4 }
  0x6c   : > { %p2384_p10 = pnand %p2383_p6, %p2377_p5 }
  0x6e   : > { %2387 = shalt.err (!%p2384_p10)
}
  0x6f   : > { %s2503_s19 = smov 128   ;;  %s2504_s14 = smov 8  }
  0x70   : > { %2168 = dma.hbm_to_vmem [thread:$0]  (!%p2690_p11), %s2686_s16, 4096, %s2688_s17, %s239_s30, %s2503_s19, %s2503_s19, %s2504_s14  }
  0x71   : > { %s1646_s7 = sshll.u32 %s2679_s12, 7  ;;  %s1759_s10 = sshll.u32 %s2496_s24, 11 }
  0x72   : > { %s2728_s15 = scalar_lea.hbm %s2988_s1, %s1759_s10  ;;  %s263_s26 = scalar_lea.vmem [#allocation5], %s1646_s7 }
  0x73   : > { %s270_s0 = sshll.u32 %s263_s26, 4  ;;  %s3013_s2 = sand.u32 1, %s2496_s24   ;;  %s2730_s0 = int_to_ptr.vmem [resolvable:$true] %s270_s0 }
  0x74   : > { %s2734_s4 = scalar_lea.sflag [#allocation6], %s3013_s2  ;;  %s2388_s11 = scalar_lea.hbm %s2728_s15, 2048 }
  0x75   : > { %p2389_p4 = scmp.ne.s32.totalorder %s2728_s15, %s2388_s11  ;;  %s2393_s17 = scalar_lea.hbm %s2988_s1, 4096 }
  0x76   : > { %p2394_p3 = scmp.lt.u32.totalorder %s2728_s15, %s2988_s1  ;;  %p2395_p7 = scmp.lt.u32.totalorder %s2393_s17, %s2388_s11 }
  0x77   : > { %p2391_p5 = pnand %p2389_p4, %p2360_p0  ;;  %p2397_p12 = scmp.lt.u32.totalorder %s2388_s11, %s2728_s15 }
  0x78   : > { %p2396_p9 = por %p2395_p7, %p2394_p3 }
  0x79   : > { %p2392_p2 = pneg %p2391_p5 }
  0x7a   : > { %p2398_p1 = por %p2397_p12, %p2396_p9 }
  0x7c   : > { %p2399_p13 = pnand %p2398_p1, %p2392_p2 }
  0x7e   : > { %2402 = shalt.err (!%p2399_p13)
}
  0x7f   : > { %s2403_s2 = scalar_lea.vmem %s2730_s0, 2048  ;;  %s2505_s26 = smov [#allocation5]  }
  0x80   : > { %p2404_p6 = scmp.ne.s32.totalorder %s2730_s0, %s2403_s2  ;;  %s2408_s14 = sshll.u32 %s2505_s26, 4  ;;  %s2409_s14 = int_to_ptr.vmem [resolvable:$false] %s2408_s14 }
  0x81   : > { %s2410_s7 = scalar_lea.vmem %s2409_s14, 4096  ;;  %p2411_p5 = scmp.lt.s32.totalorder %s2730_s0, %s2409_s14 }
  0x82   : > { %p2406_p10 = pnand %p2404_p6, %p2360_p0  ;;  %p2412_p3 = scmp.lt.s32.totalorder %s2410_s7, %s2403_s2 }
  0x84   : > { %p2407_p4 = pneg %p2406_p10  ;;  %p2413_p7 = por %p2412_p3, %p2411_p5 }
  0x86   : > { %p2414_p9 = pnand %p2413_p7, %p2407_p4 }
  0x88   : > { %2417 = shalt.err (!%p2414_p9)
}
  0x89   : > { %s3014_s11 = smov 4   ;;  %s3015_s10 = smov 64  }
  0x8a   : > { %2171 = dma.hbm_to_vmem [thread:$0]  (!%p2690_p11), %s2728_s15, 2048, %s2730_s0, %s2734_s4, %s3015_s10, %s3015_s10, %s3014_s11  }
  0x8b   : > { %282 = sbr.rel (%p2584_p8) target bundleno = 984 (0x3d8), region = 44  ;;  %s2766_s13 = sand.u32 (!%p2584_p8), 1, %s2488_s22  }
  0x8c   : > { %s1650_s20 = sshll.u32 (!%p2584_p8), %s2766_s13, 8  ;;  %s285_s12 = scalar_lea.sflag (!%p2584_p8), [#allocation3], %s2766_s13 }
  0x8d   : > { %s2770_s16 = scalar_lea.vmem (!%p2584_p8), [#allocation2], %s1650_s20  ;;  %p3016_p0 = scmp.ne.s32.totalorder (!%p2584_p8), %s3002_s27, 0 }
  0x92   : > { %2463 = dma.done.wait (%p3016_p0), %s285_s12, 4096  }
  0x93   : > { %2465 = vsyncadd (%p3016_p0), %s285_s12, 4294963200  ;;  %s293_s0 = sand.u32 1, %s2565_s25   ;;  %s1651_s4 = sshll.u32 %s2766_s13, 7 }
  0x94   : > { %s294_s29 = scalar_lea.sflag [#allocation6], %s293_s0  ;;  %s2780_s18 = scalar_lea.vmem [#allocation5], %s1651_s4 }
  0x95   : > { %2467 = dma.done.wait (%p3016_p0), %s294_s29, 2048  }
  0x96   : > { %2469 = vsyncadd (%p3016_p0), %s294_s29, 4294965248  ;;  %p3017_p8 = scmp.eq.s32.totalorder %s2565_s25, 0 }
  0x98   : > { %2471 = dma.done.wait (%p3017_p8), [#allocation6], 1024   ;;  %p3018_p11 = pmov %p3017_p8 }
  0x99   : > { %p3019_p2 = pmov %p3017_p8 }
  0x9a   : > { %2473 = vsyncadd (%p3018_p11), [#allocation6], 4294966272 }
  0x9b   : > { %2475 = dma.done.wait (%p3019_p2), [#allocation9], 1024   ;;  %p3020_p12 = pmov %p3019_p2 }
  0x9c   : > { %v2222_v0 = vld [vmem:[%s2780_s18 + $0x40] sm:$0xff]   ;;  %v2224_v2 = vld [vmem:[%s2780_s18 + $0x48] sm:$0xff]   ;;  %v2226_v4 = vld [vmem:[%s2780_s18 + $0x50] sm:$0xff]   ;;  %s2890_s19 = scalar_lea.vmem [#allocation10], %s1651_s4  ;;  %s1792_s2 = sshll.u32 %s2565_s25, 11 }
  0x9d   : > { %2477 = vsyncadd (%p3020_p12), [#allocation9], 4294966272  ;;  %v2223_v1 = vld [vmem:[%s2780_s18] sm:$0xff]   ;;  %1888 = vmatprep.subr.bf16.mxu0 %v2222_v0  ;;  %v2225_v3 = vld [vmem:[%s2780_s18 + $0x8] sm:$0xff]   ;;  %s1523_s26 = sshll.u32 %s2890_s19, 4  ;;  %s2939_s11 = scalar_lea.hbm %s2993_s6, %s1792_s2  ;;  %s2941_s26 = int_to_ptr.vmem [resolvable:$true] %s1523_s26 }
  0x9e   : > { %1889 = vmatpush3.bf16.msra.mxu0 %v2223_v1  ;;  %v2227_v5 = vld [vmem:[%s2780_s18 + $0x10] sm:$0xff]   ;;  %v2228_v6 = vld [vmem:[%s2780_s18 + $0x58] sm:$0xff]   ;;  %v2230_v8 = vld [vmem:[%s2780_s18 + $0x60] sm:$0xff]   ;;  %s1510_s25 = scalar_lea.sflag [#allocation4], %s2766_s13  ;;  %s2418_s10 = scalar_lea.vmem %s2941_s26, 2048 }
  0x9f   : > { %1890 = vmatprep.subr.bf16.mxu0 %v2224_v2  ;;  %v2229_v7 = vld [vmem:[%s2780_s18 + $0x18] sm:$0xff]   ;;  %v2231_v9 = vld [vmem:[%s2780_s18 + $0x20] sm:$0xff]   ;;  %v2232_v10 = vld [vmem:[%s2780_s18 + $0x68] sm:$0xff]   ;;  %p2419_p1 = scmp.ne.s32.totalorder %s2941_s26, %s2418_s10  ;;  %p3021_p13 = scmp.ne.s32.totalorder %s3009_s9, 0 }
  0xa0   : > { %v2240_v11 = vld [vmem:[%s2770_s16 + $0x4] ss:$8 sps:$4 sm:$0xff]   ;;  %v2234_v13 = vld [vmem:[%s2780_s18 + $0x70] sm:$0xff]   ;;  %v2236_v15 = vld [vmem:[%s2780_s18 + $0x78] sm:$0xff]   ;;  %s2506_s20 = smov [#allocation10]  }
  0xa1   : > { %v2233_v12 = vld [vmem:[%s2780_s18 + $0x28] sm:$0xff]   ;;  %692 = vmatprep.mubr.bf16.mxu0 %v2240_v11  ;;  %v2235_v14 = vld [vmem:[%s2780_s18 + $0x30] sm:$0xff]   ;;  %v2237_v16 = vld [vmem:[%s2780_s18 + $0x38] sm:$0xff]   ;;  %p2420_p6 = pnand %p2419_p1, %p3021_p13  ;;  %s2422_s12 = sshll.u32 %s2506_s20, 4  ;;  %s2423_s12 = int_to_ptr.vmem [resolvable:$false] %s2422_s12 }
  0xa2   : > { %1891 = vmatpush3.bf16.msra.mxu0 %v2225_v3  ;;  %v2238_v17 = vld [vmem:[%s2770_s16] ss:$8 sps:$4 sm:$0xff]   ;;  %v2241_v18 = vld [vmem:[%s2770_s16 + $0x14] ss:$8 sps:$4 sm:$0xff]   ;;  %v2243_v19 = vld [vmem:[%s2770_s16 + $0x10] ss:$8 sps:$4 sm:$0xff]   ;;  %p2425_p4 = scmp.lt.s32.totalorder %s2941_s26, %s2423_s12 }
  0xa3   : > { %1892 = vmatprep.subr.bf16.mxu0 %v2226_v4  ;;  %v2244_v20 = vld [vmem:[%s2770_s16 + $0x24] ss:$8 sps:$4 sm:$0xff]   ;;  %v2288_v23 = vld [vmem:[#allocation7 + $0x10] sm:$0xff]   ;;  %v2246_v24 = vld [vmem:[%s2770_s16 + $0x20] ss:$8 sps:$4 sm:$0xff]   ;;  %p2421_p10 = pneg %p2420_p6 }
  0xa4   : > { %v2286_v21 = vld [vmem:[#allocation7] sm:$0xff]   ;;  %v2287_v22 = vld [vmem:[#allocation7 + $0x8] sm:$0xff]   ;;  %v2289_v25 = vld [vmem:[#allocation7 + $0x18] sm:$0xff]  }
  0xa5   : > { %2048 = vmatprep.subr.bf16.mxu1 %v2286_v21  ;;  %v2247_v26 = vld [vmem:[%s2770_s16 + $0x34] ss:$8 sps:$4 sm:$0xff]   ;;  %v2249_v27 = vld [vmem:[%s2770_s16 + $0x30] ss:$8 sps:$4 sm:$0xff]   ;;  %v2250_v28 = vld [vmem:[%s2770_s16 + $0x44] ss:$8 sps:$4 sm:$0xff]  }
  0xa6   : > { %1893 = vmatpush3.bf16.msra.mxu0 %v2227_v5  ;;  %2049 = vmatpush3.bf16.msra.mxu1 %v2286_v21  ;;  %v2252_v29 = vld [vmem:[%s2770_s16 + $0x40] ss:$8 sps:$4 sm:$0xff]   ;;  %v2253_v30 = vld [vmem:[%s2770_s16 + $0x54] ss:$8 sps:$4 sm:$0xff]   ;;  %v2255_v31 = vld [vmem:[%s2770_s16 + $0x50] ss:$8 sps:$4 sm:$0xff]  }
  0xa7   : > { %1894 = vmatprep.subr.bf16.mxu0 %v2228_v6  ;;  %2050 = vmatprep.subr.bf16.mxu1 %v2287_v22  ;;  %v2256_v32 = vld [vmem:[%s2770_s16 + $0x64] ss:$8 sps:$4 sm:$0xff]   ;;  %v2258_v33 = vld [vmem:[%s2770_s16 + $0x60] ss:$8 sps:$4 sm:$0xff]   ;;  %v2259_v34 = vld [vmem:[%s2770_s16 + $0x74] ss:$8 sps:$4 sm:$0xff]  }
  0xa8   : > { %v2261_v35 = vld [vmem:[%s2770_s16 + $0x70] ss:$8 sps:$4 sm:$0xff]   ;;  %v2262_v36 = vld [vmem:[%s2770_s16 + $0x84] ss:$8 sps:$4 sm:$0xff]   ;;  %v2264_v37 = vld [vmem:[%s2770_s16 + $0x80] ss:$8 sps:$4 sm:$0xff]  }
  0xa9   : > { %v2265_v38 = vld [vmem:[%s2770_s16 + $0x94] ss:$8 sps:$4 sm:$0xff]   ;;  %v2267_v39 = vld [vmem:[%s2770_s16 + $0x90] ss:$8 sps:$4 sm:$0xff]   ;;  %v2268_v40 = vld [vmem:[%s2770_s16 + $0xa4] ss:$8 sps:$4 sm:$0xff]  }
  0xaa   : > { %1895 = vmatpush3.bf16.msra.mxu0 %v2229_v7  ;;  %2051 = vmatpush3.bf16.msra.mxu1 %v2287_v22  ;;  %v2270_v41 = vld [vmem:[%s2770_s16 + $0xa0] ss:$8 sps:$4 sm:$0xff]   ;;  %v2271_v42 = vld [vmem:[%s2770_s16 + $0xb4] ss:$8 sps:$4 sm:$0xff]   ;;  %v2273_v44 = vld [vmem:[%s2770_s16 + $0xb0] ss:$8 sps:$4 sm:$0xff]  }
  0xab   : > { %1896 = vmatprep.subr.bf16.mxu0 %v2230_v8  ;;  %2052 = vmatprep.subr.bf16.mxu1 %v2288_v23  ;;  %v2290_v43 = vld [vmem:[#allocation7 + $0x20] sm:$0xff]   ;;  %v2291_v46 = vld [vmem:[#allocation7 + $0x28] sm:$0xff]   ;;  %v2292_v47 = vld [vmem:[#allocation7 + $0x30] sm:$0xff]  }
  0xac   : > { %v2274_v45 = vld [vmem:[%s2770_s16 + $0xc4] ss:$8 sps:$4 sm:$0xff]   ;;  %v2276_v48 = vld [vmem:[%s2770_s16 + $0xc0] ss:$8 sps:$4 sm:$0xff]   ;;  %v2277_v49 = vld [vmem:[%s2770_s16 + $0xd4] ss:$8 sps:$4 sm:$0xff]  }
  0xad   : > { %v2293_v50 = vld [vmem:[#allocation7 + $0x38] sm:$0xff]   ;;  %v2280_v52 = vld [vmem:[%s2770_s16 + $0xe4] ss:$8 sps:$4 sm:$0xff]   ;;  %v2282_v53 = vld [vmem:[%s2770_s16 + $0xe0] ss:$8 sps:$4 sm:$0xff]  }
  0xae   : > { %1897 = vmatpush3.bf16.msra.mxu0 %v2231_v9  ;;  %2053 = vmatpush3.bf16.msra.mxu1 %v2288_v23  ;;  %v2279_v51 = vld [vmem:[%s2770_s16 + $0xd0] ss:$8 sps:$4 sm:$0xff]   ;;  %v2283_v54 = vld [vmem:[%s2770_s16 + $0xf4] ss:$8 sps:$4 sm:$0xff]   ;;  %v2294_v57 = vld [vmem:[#allocation8] sm:$0xff]  }
  0xaf   : > { %1898 = vmatprep.subr.bf16.mxu0 %v2232_v10  ;;  %2054 = vmatprep.subr.bf16.mxu1 %v2289_v25  ;;  %v2285_v55 = vld [vmem:[%s2770_s16 + $0xf0] ss:$8 sps:$4 sm:$0xff]   ;;  %v2295_v7 = vld [vmem:[#allocation8 + $0x8] sm:$0xff]   ;;  %v2298_v21 = vld [vmem:[#allocation8 + $0x20] sm:$0xff]   ;;  %s2424_s16 = scalar_lea.vmem %s2423_s12, 4096 }
  0xb0   : > { %p2426_p5 = scmp.lt.s32.totalorder %s2424_s16, %s2418_s10 }
  0xb2   : > { %1899 = vmatpush3.bf16.msra.mxu0 %v2233_v12  ;;  %2055 = vmatpush3.bf16.msra.mxu1 %v2289_v25  ;;  %v2296_v12 = vld [vmem:[#allocation8 + $0x10] sm:$0xff]   ;;  %v2299_v25 = vld [vmem:[#allocation8 + $0x28] sm:$0xff]   ;;  %p2427_p3 = por %p2426_p5, %p2425_p4 }
  0xb3   : > { %1900 = vmatprep.subr.bf16.mxu0 %v2234_v13  ;;  %2056 = vmatprep.subr.bf16.mxu1 %v2290_v43 }
  0xb4   : > { %p2428_p7 = pnand %p2427_p3, %p2421_p10 }
  0xb6   : > { %1901 = vmatpush3.bf16.msra.mxu0 %v2235_v14  ;;  %2057 = vmatpush3.bf16.msra.mxu1 %v2290_v43 }
  0xb7   : > { %1902 = vmatprep.subr.bf16.mxu0 %v2236_v15  ;;  %2058 = vmatprep.subr.bf16.mxu1 %v2291_v46 }
  0xba   : > { %1903 = vmatpush3.bf16.msra.mxu0 %v2237_v16  ;;  %2059 = vmatpush3.bf16.msra.mxu1 %v2291_v46  ;;  %v2297_v16 = vld [vmem:[#allocation8 + $0x18] sm:$0xff]  }
  0xbb   : > { %2060 = vmatprep.subr.bf16.mxu1 %v2292_v47 }
  0xbd   : > { %693 = vmatmul.mubr.bf16.vlgmr.msra.gmra.mrb[0].mxu0 %v2238_v17 }
  0xbe   : > { %700 = vmatprep.mubr.bf16.mxu0 %v2241_v18  ;;  %2061 = vmatpush3.bf16.msra.mxu1 %v2292_v47 }
  0xbf   : > { %2062 = vmatprep.subr.bf16.mxu1 %v2293_v50 }
  0xc2   : > { %2063 = vmatpush3.bf16.msra.mxu1 %v2293_v50 }
  0xc3   : > { %2096 = vmatprep.subr.bf16.mxu1 %v2294_v57 }
  0xc5   : > { %701 = vmatmul.mubr.bf16.gmra.mrb[4].mxu0 %v2243_v19 }
  0xc6   : > { %708 = vmatprep.mubr.bf16.mxu0 %v2244_v20 }
  0xcd   : > { %709 = vmatmul.mubr.bf16.gmra.mrb[8].mxu0 %v2246_v24 }
  0xce   : > { %716 = vmatprep.mubr.bf16.mxu0 %v2247_v26 }
  0xd5   : > { %717 = vmatmul.mubr.bf16.gmra.mrb[12].mxu0 %v2249_v27 }
  0xd6   : > { %724 = vmatprep.mubr.bf16.mxu0 %v2250_v28 }
  0xdd   : > { %725 = vmatmul.mubr.bf16.gmra.mrb[16].mxu0 %v2252_v29 }
  0xde   : > { %732 = vmatprep.mubr.bf16.mxu0 %v2253_v30 }
  0xe5   : > { %733 = vmatmul.mubr.bf16.gmra.mrb[20].mxu0 %v2255_v31 }
  0xe6   : > { %740 = vmatprep.mubr.bf16.mxu0 %v2256_v32 }
  0xed   : > { %741 = vmatmul.mubr.bf16.gmra.mrb[24].mxu0 %v2258_v33 }
  0xee   : > { %748 = vmatprep.mubr.bf16.mxu0 %v2259_v34 }
  0xf5   : > { %749 = vmatmul.mubr.bf16.gmra.mrb[28].mxu0 %v2261_v35 }
  0xf6   : > { %756 = vmatprep.mubr.bf16.mxu0 %v2262_v36 }
  0xfd   : > { %757 = vmatmul.mubr.bf16.gmra.mrb[32].mxu0 %v2264_v37 }
  0xfe   : > { %764 = vmatprep.mubr.bf16.mxu0 %v2265_v38 }
 0x105   : > { %765 = vmatmul.mubr.bf16.gmra.mrb[36].mxu0 %v2267_v39 }
 0x106   : > { %772 = vmatprep.mubr.bf16.mxu0 %v2268_v40 }
 0x10d   : > { %773 = vmatmul.mubr.bf16.gmra.mrb[40].mxu0 %v2270_v41 }
 0x10e   : > { %780 = vmatprep.mubr.bf16.mxu0 %v2271_v42 }
 0x115   : > { %781 = vmatmul.mubr.bf16.gmra.mrb[44].mxu0 %v2273_v44 }
 0x116   : > { %788 = vmatprep.mubr.bf16.mxu0 %v2274_v45 }
 0x11d   : > { %789 = vmatmul.mubr.bf16.gmra.mrb[48].mxu0 %v2276_v48 }
 0x11e   : > { %796 = vmatprep.mubr.bf16.mxu0 %v2277_v49 }
 0x125   : > { %797 = vmatmul.mubr.bf16.gmra.mrb[52].mxu0 %v2279_v51 }
 0x126   : > { %804 = vmatprep.mubr.bf16.mxu0 %v2280_v52 }
 0x12d   : > { %805 = vmatmul.mubr.bf16.gmra.mrb[56].mxu0 %v2282_v53 }
 0x12e   : > { %812 = vmatprep.mubr.bf16.mxu0 %v2283_v54 }
 0x135   : > { %813 = vmatmul.mubr.bf16.gmra.mrb[60].mxu0 %v2285_v55 }
 0x190   : > { %v1904_v56 = vpop.f32.mrb[0].mxu0 }
 0x191   : > { %v1905_v58 = vpop.f32.mrb[1].mxu0 }
 0x192   : > { %v1906_v59 = vadd.f32 %v1905_v58, %v1904_v56  ;;  %v1907_v60 = vpop.f32.mrb[2].mxu0 }
 0x193   : > { %v1908_v61 = vpop.f32.mrb[3].mxu0 }
 0x194   : > { %v1909_v62 = vadd.f32 %v1908_v61, %v1907_v60 }
 0x196   : > { %v821_v63 = vpack.c.bf16 %v1909_v62, %v1906_v59 }
 0x198   : > { %v1910_v0 = vpop.f32.mrb[4].mxu0  ;;  %2064 = vmatprep.mubr.bf16.mxu1 %v821_v63 }
 0x199   : > { %v1911_v1 = vpop.f32.mrb[5].mxu0 }
 0x19a   : > { %v1912_v2 = vadd.f32 %v1911_v1, %v1910_v0  ;;  %v1913_v3 = vpop.f32.mrb[6].mxu0 }
 0x19b   : > { %v1914_v4 = vpop.f32.mrb[7].mxu0 }
 0x19c   : > { %v1915_v5 = vadd.f32 %v1914_v4, %v1913_v3 }
 0x19e   : > { %v822_v6 = vpack.c.bf16 %v1915_v5, %v1912_v2 }
 0x1a0   : > { %v1916_v8 = vpop.f32.mrb[8].mxu0  ;;  %2065 = vmatmul.mubr.bf16.vlgmr.msra.gmra.mrb[0].mxu1 %v822_v6 }
 0x1a1   : > { %v1917_v9 = vpop.f32.mrb[9].mxu0  ;;  %2097 = vmatpush3.bf16.msra.mxu1 %v2294_v57 }
 0x1a2   : > { %v1918_v10 = vadd.f32 %v1917_v9, %v1916_v8  ;;  %v1919_v11 = vpop.f32.mrb[10].mxu0  ;;  %2098 = vmatprep.subr.bf16.mxu1 %v2295_v7 }
 0x1a3   : > { %v1920_v13 = vpop.f32.mrb[11].mxu0 }
 0x1a4   : > { %v1921_v14 = vadd.f32 %v1920_v13, %v1919_v11 }
 0x1a5   : > { %2099 = vmatpush3.bf16.msra.mxu1 %v2295_v7 }
 0x1a6   : > { %v823_v15 = vpack.c.bf16 %v1921_v14, %v1918_v10  ;;  %2100 = vmatprep.subr.bf16.mxu1 %v2296_v12 }
 0x1a8   : > { %v1922_v17 = vpop.f32.mrb[12].mxu0  ;;  %2068 = vmatprep.mubr.bf16.mxu1 %v823_v15 }
 0x1a9   : > { %v1923_v18 = vpop.f32.mrb[13].mxu0  ;;  %2101 = vmatpush3.bf16.msra.mxu1 %v2296_v12 }
 0x1aa   : > { %v1924_v19 = vadd.f32 %v1923_v18, %v1922_v17  ;;  %v1925_v20 = vpop.f32.mrb[14].mxu0  ;;  %2102 = vmatprep.subr.bf16.mxu1 %v2297_v16 }
 0x1ab   : > { %v1926_v22 = vpop.f32.mrb[15].mxu0 }
 0x1ac   : > { %v1927_v23 = vadd.f32 %v1926_v22, %v1925_v20 }
 0x1ad   : > { %2103 = vmatpush3.bf16.msra.mxu1 %v2297_v16 }
 0x1ae   : > { %v824_v24 = vpack.c.bf16 %v1927_v23, %v1924_v19  ;;  %2104 = vmatprep.subr.bf16.mxu1 %v2298_v21 }
 0x1b0   : > { %v1928_v26 = vpop.f32.mrb[16].mxu0  ;;  %2069 = vmatmul.mubr.bf16.gmra.mrb[4].mxu1 %v824_v24  ;;  %v2300_v24 = vld [vmem:[#allocation8 + $0x30] sm:$0xff]  }
 0x1b1   : > { %v1929_v27 = vpop.f32.mrb[17].mxu0  ;;  %2105 = vmatpush3.bf16.msra.mxu1 %v2298_v21 }
 0x1b2   : > { %v1930_v28 = vadd.f32 %v1929_v27, %v1928_v26  ;;  %v1931_v29 = vpop.f32.mrb[18].mxu0  ;;  %2106 = vmatprep.subr.bf16.mxu1 %v2299_v25  ;;  %v2301_v27 = vld [vmem:[#allocation8 + $0x38] sm:$0xff]  }
 0x1b3   : > { %v1932_v30 = vpop.f32.mrb[19].mxu0 }
 0x1b4   : > { %v1933_v31 = vadd.f32 %v1932_v30, %v1931_v29 }
 0x1b5   : > { %2107 = vmatpush3.bf16.msra.mxu1 %v2299_v25 }
 0x1b6   : > { %v825_v32 = vpack.c.bf16 %v1933_v31, %v1930_v28  ;;  %2108 = vmatprep.subr.bf16.mxu1 %v2300_v24 }
 0x1b8   : > { %v1934_v33 = vpop.f32.mrb[20].mxu0  ;;  %2072 = vmatprep.mubr.bf16.mxu1 %v825_v32 }
 0x1b9   : > { %v1935_v34 = vpop.f32.mrb[21].mxu0  ;;  %2109 = vmatpush3.bf16.msra.mxu1 %v2300_v24 }
 0x1ba   : > { %v1936_v35 = vadd.f32 %v1935_v34, %v1934_v33  ;;  %v1937_v36 = vpop.f32.mrb[22].mxu0  ;;  %2110 = vmatprep.subr.bf16.mxu1 %v2301_v27 }
 0x1bb   : > { %v1938_v37 = vpop.f32.mrb[23].mxu0 }
 0x1bc   : > { %v1939_v38 = vadd.f32 %v1938_v37, %v1937_v36 }
 0x1bd   : > { %2111 = vmatpush3.bf16.msra.mxu1 %v2301_v27 }
 0x1be   : > { %v826_v39 = vpack.c.bf16 %v1939_v38, %v1936_v35 }
 0x1c0   : > { %v1940_v40 = vpop.f32.mrb[24].mxu0  ;;  %2073 = vmatmul.mubr.bf16.gmra.mrb[8].mxu1 %v826_v39 }
 0x1c1   : > { %v1941_v41 = vpop.f32.mrb[25].mxu0 }
 0x1c2   : > { %v1942_v42 = vadd.f32 %v1941_v41, %v1940_v40  ;;  %v1943_v43 = vpop.f32.mrb[26].mxu0 }
 0x1c3   : > { %v1944_v44 = vpop.f32.mrb[27].mxu0 }
 0x1c4   : > { %v1945_v45 = vadd.f32 %v1944_v44, %v1943_v43 }
 0x1c6   : > { %v827_v46 = vpack.c.bf16 %v1945_v45, %v1942_v42 }
 0x1c8   : > { %v1946_v47 = vpop.f32.mrb[28].mxu0  ;;  %2076 = vmatprep.mubr.bf16.mxu1 %v827_v46 }
 0x1c9   : > { %v1947_v48 = vpop.f32.mrb[29].mxu0 }
 0x1ca   : > { %v1948_v49 = vadd.f32 %v1947_v48, %v1946_v47  ;;  %v1949_v50 = vpop.f32.mrb[30].mxu0  ;;  %v2845_v48 = vld [vmem:[%s2990_s3] ss:$0 sm:$0xff] }
 0x1cb   : > { %v1950_v51 = vpop.f32.mrb[31].mxu0 }
 0x1cc   : > { %v1951_v52 = vadd.f32 %v1950_v51, %v1949_v50 }
 0x1ce   : > { %v828_v53 = vpack.c.bf16 %v1951_v52, %v1948_v49 }
 0x1d0   : > { %v1952_v54 = vpop.f32.mrb[32].mxu0  ;;  %2077 = vmatmul.mubr.bf16.gmra.mrb[12].mxu1 %v828_v53 }
 0x1d1   : > { %v1953_v55 = vpop.f32.mrb[33].mxu0 }
 0x1d2   : > { %v1954_v56 = vadd.f32 %v1953_v55, %v1952_v54  ;;  %v1955_v57 = vpop.f32.mrb[34].mxu0 }
 0x1d3   : > { %v1956_v58 = vpop.f32.mrb[35].mxu0 }
 0x1d4   : > { %v1957_v59 = vadd.f32 %v1956_v58, %v1955_v57 }
 0x1d6   : > { %v829_v60 = vpack.c.bf16 %v1957_v59, %v1954_v56 }
 0x1d8   : > { %v1958_v61 = vpop.f32.mrb[36].mxu0  ;;  %2080 = vmatprep.mubr.bf16.mxu1 %v829_v60 }
 0x1d9   : > { %v1959_v62 = vpop.f32.mrb[37].mxu0 }
 0x1da   : > { %v1960_v63 = vadd.f32 %v1959_v62, %v1958_v61  ;;  %v1961_v0 = vpop.f32.mrb[38].mxu0 }
 0x1db   : > { %v1962_v1 = vpop.f32.mrb[39].mxu0 }
 0x1dc   : > { %v1963_v2 = vadd.f32 %v1962_v1, %v1961_v0 }
 0x1de   : > { %v830_v3 = vpack.c.bf16 %v1963_v2, %v1960_v63 }
 0x1e0   : > { %v1964_v4 = vpop.f32.mrb[40].mxu0  ;;  %2081 = vmatmul.mubr.bf16.gmra.mrb[16].mxu1 %v830_v3 }
 0x1e1   : > { %v1965_v5 = vpop.f32.mrb[41].mxu0 }
 0x1e2   : > { %v1966_v6 = vadd.f32 %v1965_v5, %v1964_v4  ;;  %v1967_v7 = vpop.f32.mrb[42].mxu0 }
 0x1e3   : > { %v1968_v8 = vpop.f32.mrb[43].mxu0 }
 0x1e4   : > { %v1969_v9 = vadd.f32 %v1968_v8, %v1967_v7 }
 0x1e6   : > { %v831_v10 = vpack.c.bf16 %v1969_v9, %v1966_v6 }
 0x1e8   : > { %v1970_v11 = vpop.f32.mrb[44].mxu0  ;;  %2084 = vmatprep.mubr.bf16.mxu1 %v831_v10 }
 0x1e9   : > { %v1971_v12 = vpop.f32.mrb[45].mxu0 }
 0x1ea   : > { %v1972_v13 = vadd.f32 %v1971_v12, %v1970_v11  ;;  %v1973_v14 = vpop.f32.mrb[46].mxu0 }
 0x1eb   : > { %v1974_v15 = vpop.f32.mrb[47].mxu0 }
 0x1ec   : > { %v1975_v16 = vadd.f32 %v1974_v15, %v1973_v14 }
 0x1ee   : > { %v832_v17 = vpack.c.bf16 %v1975_v16, %v1972_v13 }
 0x1f0   : > { %v1976_v18 = vpop.f32.mrb[48].mxu0  ;;  %2085 = vmatmul.mubr.bf16.gmra.mrb[20].mxu1 %v832_v17 }
 0x1f1   : > { %v1977_v19 = vpop.f32.mrb[49].mxu0 }
 0x1f2   : > { %v1978_v20 = vadd.f32 %v1977_v19, %v1976_v18  ;;  %v1979_v21 = vpop.f32.mrb[50].mxu0 }
 0x1f3   : > { %v1980_v22 = vpop.f32.mrb[51].mxu0 }
 0x1f4   : > { %v1981_v23 = vadd.f32 %v1980_v22, %v1979_v21 }
 0x1f6   : > { %v833_v25 = vpack.c.bf16 %v1981_v23, %v1978_v20 }
 0x1f8   : > { %v1982_v26 = vpop.f32.mrb[52].mxu0  ;;  %2088 = vmatprep.mubr.bf16.mxu1 %v833_v25 }
 0x1f9   : > { %v1983_v28 = vpop.f32.mrb[53].mxu0 }
 0x1fa   : > { %v1984_v29 = vadd.f32 %v1983_v28, %v1982_v26  ;;  %v1985_v30 = vpop.f32.mrb[54].mxu0 }
 0x1fb   : > { %v1986_v31 = vpop.f32.mrb[55].mxu0 }
 0x1fc   : > { %v1987_v32 = vadd.f32 %v1986_v31, %v1985_v30 }
 0x1fe   : > { %v834_v33 = vpack.c.bf16 %v1987_v32, %v1984_v29 }
 0x200   : > { %v1988_v34 = vpop.f32.mrb[56].mxu0  ;;  %2089 = vmatmul.mubr.bf16.gmra.mrb[24].mxu1 %v834_v33 }
 0x201   : > { %v1989_v35 = vpop.f32.mrb[57].mxu0 }
 0x202   : > { %v1990_v36 = vadd.f32 %v1989_v35, %v1988_v34  ;;  %v1991_v37 = vpop.f32.mrb[58].mxu0 }
 0x203   : > { %v1992_v38 = vpop.f32.mrb[59].mxu0 }
 0x204   : > { %v1993_v39 = vadd.f32 %v1992_v38, %v1991_v37 }
 0x206   : > { %v835_v40 = vpack.c.bf16 %v1993_v39, %v1990_v36 }
 0x208   : > { %v1994_v41 = vpop.f32.mrb[60].mxu0  ;;  %2092 = vmatprep.mubr.bf16.mxu1 %v835_v40 }
 0x209   : > { %v1995_v42 = vpop.f32.mrb[61].mxu0 }
 0x20a   : > { %v1996_v43 = vadd.f32 %v1995_v42, %v1994_v41  ;;  %v1997_v44 = vpop.f32.mrb[62].mxu0 }
 0x20b   : > { %v1998_v45 = vpop.f32.mrb[63].mxu0 }
 0x20c   : > { %v1999_v46 = vadd.f32 %v1998_v45, %v1997_v44 }
 0x20e   : > { %v836_v47 = vpack.c.bf16 %v1999_v46, %v1996_v43 }
 0x210   : > { %2093 = vmatmul.mubr.bf16.gmra.mrb[28].mxu1 %v836_v47 }
 0x273   : > { %v2066_v49 = vpop.f32.mrb[0].mxu1 }
 0x274   : > { %v951_v50 = vadd.f32 %v2066_v49, %v2845_v48  ;;  %v942_v51 = vpop.f32.mrb[1].mxu1 }
 0x275   : > { %v943_v52 = vadd.f32 %v2845_v48, %v942_v51  ;;  %v2067_v53 = vpop.f32.mrb[2].mxu1 }
 0x276   : > { %v954_v54 = vadd.f32 %v2067_v53, %v2845_v48  ;;  %v945_v55 = vpop.f32.mrb[3].mxu1  ;;  %v1071_v57 = vmax.f32 %v951_v50, 0.0 }
 0x277   : > { %v946_v56 = vadd.f32 %v2845_v48, %v945_v55  ;;  %v1069_v59 = vmax.f32 %v943_v52, 0.0 }
 0x278   : > { %v1072_v58 = vmax.f32 %v954_v54, 0.0 }
 0x279   : > { %v1070_v60 = vmax.f32 %v946_v56, 0.0 }
 0x27a   : > { %v1102_v61 = vpack.c.bf16 %v1072_v58, %v1071_v57 }
 0x27b   : > { %v1101_v62 = vpack.c.bf16 %v1070_v60, %v1069_v59 }
 0x27d   : > { %2112 = vmatprep.mubr.bf16.mxu1 %v1101_v62 }
 0x27e   : > { %2113 = vmatmul.mubr.bf16.vlgmr.msra.gmra.mrb[32].mxu1 %v1102_v61 }
 0x283   : > { %v2070_v63 = vpop.f32.mrb[4].mxu1 }
 0x284   : > { %v967_v0 = vadd.f32 %v2070_v63, %v2845_v48  ;;  %v958_v1 = vpop.f32.mrb[5].mxu1 }
 0x285   : > { %v959_v2 = vadd.f32 %v2845_v48, %v958_v1  ;;  %v2071_v3 = vpop.f32.mrb[6].mxu1 }
 0x286   : > { %v970_v4 = vadd.f32 %v2071_v3, %v2845_v48  ;;  %v961_v5 = vpop.f32.mrb[7].mxu1  ;;  %v1075_v7 = vmax.f32 %v967_v0, 0.0 }
 0x287   : > { %v962_v6 = vadd.f32 %v2845_v48, %v961_v5  ;;  %v1073_v9 = vmax.f32 %v959_v2, 0.0 }
 0x288   : > { %v1076_v8 = vmax.f32 %v970_v4, 0.0 }
 0x289   : > { %v1074_v10 = vmax.f32 %v962_v6, 0.0 }
 0x28a   : > { %v1104_v11 = vpack.c.bf16 %v1076_v8, %v1075_v7 }
 0x28b   : > { %v1103_v12 = vpack.c.bf16 %v1074_v10, %v1073_v9 }
 0x28d   : > { %2116 = vmatprep.mubr.bf16.mxu1 %v1103_v12 }
 0x28e   : > { %2117 = vmatmul.mubr.bf16.gmra.mrb[36].mxu1 %v1104_v11 }
 0x293   : > { %v2074_v13 = vpop.f32.mrb[8].mxu1 }
 0x294   : > { %v983_v14 = vadd.f32 %v2074_v13, %v2845_v48  ;;  %v974_v15 = vpop.f32.mrb[9].mxu1 }
 0x295   : > { %v975_v16 = vadd.f32 %v2845_v48, %v974_v15  ;;  %v2075_v17 = vpop.f32.mrb[10].mxu1 }
 0x296   : > { %v986_v18 = vadd.f32 %v2075_v17, %v2845_v48  ;;  %v977_v19 = vpop.f32.mrb[11].mxu1  ;;  %v1079_v21 = vmax.f32 %v983_v14, 0.0 }
 0x297   : > { %v978_v20 = vadd.f32 %v2845_v48, %v977_v19  ;;  %v1077_v23 = vmax.f32 %v975_v16, 0.0 }
 0x298   : > { %v1080_v22 = vmax.f32 %v986_v18, 0.0 }
 0x299   : > { %v1078_v24 = vmax.f32 %v978_v20, 0.0 }
 0x29a   : > { %v1106_v25 = vpack.c.bf16 %v1080_v22, %v1079_v21 }
 0x29b   : > { %v1105_v26 = vpack.c.bf16 %v1078_v24, %v1077_v23 }
 0x29d   : > { %2120 = vmatprep.mubr.bf16.mxu1 %v1105_v26 }
 0x29e   : > { %2121 = vmatmul.mubr.bf16.gmra.mrb[40].mxu1 %v1106_v25 }
 0x2a3   : > { %v2078_v27 = vpop.f32.mrb[12].mxu1 }
 0x2a4   : > { %v999_v28 = vadd.f32 %v2078_v27, %v2845_v48  ;;  %v990_v29 = vpop.f32.mrb[13].mxu1 }
 0x2a5   : > { %v991_v30 = vadd.f32 %v2845_v48, %v990_v29  ;;  %v2079_v31 = vpop.f32.mrb[14].mxu1 }
 0x2a6   : > { %v1002_v32 = vadd.f32 %v2079_v31, %v2845_v48  ;;  %v993_v33 = vpop.f32.mrb[15].mxu1  ;;  %v1083_v35 = vmax.f32 %v999_v28, 0.0 }
 0x2a7   : > { %v994_v34 = vadd.f32 %v2845_v48, %v993_v33  ;;  %v1081_v37 = vmax.f32 %v991_v30, 0.0 }
 0x2a8   : > { %v1084_v36 = vmax.f32 %v1002_v32, 0.0 }
 0x2a9   : > { %v1082_v38 = vmax.f32 %v994_v34, 0.0 }
 0x2aa   : > { %v1108_v39 = vpack.c.bf16 %v1084_v36, %v1083_v35  ;;  %v2882_v35 = vld [vmem:[%s2992_s5] ss:$0 sm:$0xff] }
 0x2ab   : > { %v1107_v40 = vpack.c.bf16 %v1082_v38, %v1081_v37 }
 0x2ad   : > { %2124 = vmatprep.mubr.bf16.mxu1 %v1107_v40 }
 0x2ae   : > { %2125 = vmatmul.mubr.bf16.gmra.mrb[44].mxu1 %v1108_v39 }
 0x2b3   : > { %v2082_v41 = vpop.f32.mrb[16].mxu1 }
 0x2b4   : > { %v1015_v42 = vadd.f32 %v2082_v41, %v2845_v48  ;;  %v1006_v43 = vpop.f32.mrb[17].mxu1 }
 0x2b5   : > { %v1007_v44 = vadd.f32 %v2845_v48, %v1006_v43  ;;  %v2083_v45 = vpop.f32.mrb[18].mxu1 }
 0x2b6   : > { %v1018_v46 = vadd.f32 %v2083_v45, %v2845_v48  ;;  %v1009_v47 = vpop.f32.mrb[19].mxu1  ;;  %v1087_v50 = vmax.f32 %v1015_v42, 0.0 }
 0x2b7   : > { %v1010_v49 = vadd.f32 %v2845_v48, %v1009_v47  ;;  %v1085_v52 = vmax.f32 %v1007_v44, 0.0 }
 0x2b8   : > { %v1088_v51 = vmax.f32 %v1018_v46, 0.0 }
 0x2b9   : > { %v1086_v53 = vmax.f32 %v1010_v49, 0.0 }
 0x2ba   : > { %v1110_v54 = vpack.c.bf16 %v1088_v51, %v1087_v50 }
 0x2bb   : > { %v1109_v55 = vpack.c.bf16 %v1086_v53, %v1085_v52 }
 0x2bd   : > { %2128 = vmatprep.mubr.bf16.mxu1 %v1109_v55 }
 0x2be   : > { %2129 = vmatmul.mubr.bf16.gmra.mrb[48].mxu1 %v1110_v54 }
 0x2c3   : > { %v2086_v56 = vpop.f32.mrb[20].mxu1 }
 0x2c4   : > { %v1031_v57 = vadd.f32 %v2086_v56, %v2845_v48  ;;  %v1022_v58 = vpop.f32.mrb[21].mxu1 }
 0x2c5   : > { %v1023_v59 = vadd.f32 %v2845_v48, %v1022_v58  ;;  %v2087_v60 = vpop.f32.mrb[22].mxu1 }
 0x2c6   : > { %v1034_v61 = vadd.f32 %v2087_v60, %v2845_v48  ;;  %v1025_v62 = vpop.f32.mrb[23].mxu1  ;;  %v1091_v0 = vmax.f32 %v1031_v57, 0.0 }
 0x2c7   : > { %v1026_v63 = vadd.f32 %v2845_v48, %v1025_v62  ;;  %v1089_v2 = vmax.f32 %v1023_v59, 0.0 }
 0x2c8   : > { %v1092_v1 = vmax.f32 %v1034_v61, 0.0 }
 0x2c9   : > { %v1090_v3 = vmax.f32 %v1026_v63, 0.0 }
 0x2ca   : > { %v1112_v4 = vpack.c.bf16 %v1092_v1, %v1091_v0 }
 0x2cb   : > { %v1111_v5 = vpack.c.bf16 %v1090_v3, %v1089_v2 }
 0x2cd   : > { %2132 = vmatprep.mubr.bf16.mxu1 %v1111_v5 }
 0x2ce   : > { %2133 = vmatmul.mubr.bf16.gmra.mrb[52].mxu1 %v1112_v4 }
 0x2d3   : > { %v2090_v6 = vpop.f32.mrb[24].mxu1 }
 0x2d4   : > { %v1047_v7 = vadd.f32 %v2090_v6, %v2845_v48  ;;  %v1038_v8 = vpop.f32.mrb[25].mxu1 }
 0x2d5   : > { %v1039_v9 = vadd.f32 %v2845_v48, %v1038_v8  ;;  %v2091_v10 = vpop.f32.mrb[26].mxu1 }
 0x2d6   : > { %v1050_v11 = vadd.f32 %v2091_v10, %v2845_v48  ;;  %v1041_v12 = vpop.f32.mrb[27].mxu1  ;;  %v1095_v14 = vmax.f32 %v1047_v7, 0.0 }
 0x2d7   : > { %v1042_v13 = vadd.f32 %v2845_v48, %v1041_v12  ;;  %v1093_v16 = vmax.f32 %v1039_v9, 0.0 }
 0x2d8   : > { %v1096_v15 = vmax.f32 %v1050_v11, 0.0 }
 0x2d9   : > { %v1094_v17 = vmax.f32 %v1042_v13, 0.0 }
 0x2da   : > { %v1114_v18 = vpack.c.bf16 %v1096_v15, %v1095_v14 }
 0x2db   : > { %v1113_v19 = vpack.c.bf16 %v1094_v17, %v1093_v16 }
 0x2dd   : > { %2136 = vmatprep.mubr.bf16.mxu1 %v1113_v19 }
 0x2de   : > { %2137 = vmatmul.mubr.bf16.gmra.mrb[56].mxu1 %v1114_v18 }
 0x2e3   : > { %v2094_v20 = vpop.f32.mrb[28].mxu1 }
 0x2e4   : > { %v1063_v21 = vadd.f32 %v2094_v20, %v2845_v48  ;;  %v1054_v22 = vpop.f32.mrb[29].mxu1 }
 0x2e5   : > { %v1055_v23 = vadd.f32 %v2845_v48, %v1054_v22  ;;  %v2095_v24 = vpop.f32.mrb[30].mxu1 }
 0x2e6   : > { %v1066_v25 = vadd.f32 %v2095_v24, %v2845_v48  ;;  %v1057_v26 = vpop.f32.mrb[31].mxu1  ;;  %v1099_v28 = vmax.f32 %v1063_v21, 0.0 }
 0x2e7   : > { %v1058_v27 = vadd.f32 %v2845_v48, %v1057_v26  ;;  %v1097_v30 = vmax.f32 %v1055_v23, 0.0 }
 0x2e8   : > { %v1100_v29 = vmax.f32 %v1066_v25, 0.0 }
 0x2e9   : > { %v1098_v31 = vmax.f32 %v1058_v27, 0.0 }
 0x2ea   : > { %v1116_v32 = vpack.c.bf16 %v1100_v29, %v1099_v28 }
 0x2eb   : > { %v1115_v33 = vpack.c.bf16 %v1098_v31, %v1097_v30 }
 0x2ed   : > { %2140 = vmatprep.mubr.bf16.mxu1 %v1115_v33 }
 0x2ee   : > { %2141 = vmatmul.mubr.bf16.gmra.mrb[60].mxu1 %v1116_v32 }
 0x351   : > { %v2114_v34 = vpop.f32.mrb[32].mxu1 }
 0x352   : > { %v1222_v36 = vpop.f32.mrb[33].mxu1  ;;  %v1231_v38 = vadd.f32 %v2114_v34, %v2882_v35 }
 0x353   : > { %v2115_v37 = vpop.f32.mrb[34].mxu1  ;;  %v1223_v40 = vadd.f32 %v2882_v35, %v1222_v36 }
 0x354   : > { %v1234_v48 = vadd.f32 %v2115_v37, %v2882_v35  ;;  %v1225_v39 = vpop.f32.mrb[35].mxu1 }
 0x355   : > { %v1226_v41 = vadd.f32 %v2882_v35, %v1225_v39 }
 0x356   : > { %v1801_v42 = vpack.c.bf16 %v1234_v48, %v1231_v38 }
 0x357   : > { %v1796_v43 = vpack.c.bf16 %v1226_v41, %v1223_v40 }
 0x358   : > { %1873 = vst [vmem:[%s2890_s19 + $0x8] sm:$0xff] %v1801_v42  }
 0x359   : > { %1797 = vst [vmem:[%s2890_s19] sm:$0xff] %v1796_v43  }
 0x361   : > { %v2118_v44 = vpop.f32.mrb[36].mxu1 }
 0x362   : > { %v1238_v45 = vpop.f32.mrb[37].mxu1  ;;  %v1247_v47 = vadd.f32 %v2118_v44, %v2882_v35 }
 0x363   : > { %v2119_v46 = vpop.f32.mrb[38].mxu1  ;;  %v1239_v51 = vadd.f32 %v2882_v35, %v1238_v45 }
 0x364   : > { %v1250_v49 = vadd.f32 %v2119_v46, %v2882_v35  ;;  %v1241_v50 = vpop.f32.mrb[39].mxu1 }
 0x365   : > { %v1242_v52 = vadd.f32 %v2882_v35, %v1241_v50 }
 0x366   : > { %v1811_v53 = vpack.c.bf16 %v1250_v49, %v1247_v47 }
 0x367   : > { %v1806_v54 = vpack.c.bf16 %v1242_v52, %v1239_v51 }
 0x368   : > { %1875 = vst [vmem:[%s2890_s19 + $0x18] sm:$0xff] %v1811_v53  }
 0x369   : > { %1874 = vst [vmem:[%s2890_s19 + $0x10] sm:$0xff] %v1806_v54  }
 0x371   : > { %v2122_v55 = vpop.f32.mrb[40].mxu1 }
 0x372   : > { %v1254_v56 = vpop.f32.mrb[41].mxu1  ;;  %v1263_v58 = vadd.f32 %v2122_v55, %v2882_v35 }
 0x373   : > { %v2123_v57 = vpop.f32.mrb[42].mxu1  ;;  %v1255_v61 = vadd.f32 %v2882_v35, %v1254_v56 }
 0x374   : > { %v1266_v59 = vadd.f32 %v2123_v57, %v2882_v35  ;;  %v1257_v60 = vpop.f32.mrb[43].mxu1 }
 0x375   : > { %v1258_v62 = vadd.f32 %v2882_v35, %v1257_v60 }
 0x376   : > { %v1821_v63 = vpack.c.bf16 %v1266_v59, %v1263_v58 }
 0x377   : > { %v1816_v0 = vpack.c.bf16 %v1258_v62, %v1255_v61 }
 0x378   : > { %1877 = vst [vmem:[%s2890_s19 + $0x28] sm:$0xff] %v1821_v63  }
 0x379   : > { %1876 = vst [vmem:[%s2890_s19 + $0x20] sm:$0xff] %v1816_v0  }
 0x381   : > { %v2126_v1 = vpop.f32.mrb[44].mxu1 }
 0x382   : > { %v1270_v2 = vpop.f32.mrb[45].mxu1  ;;  %v1279_v4 = vadd.f32 %v2126_v1, %v2882_v35 }
 0x383   : > { %v2127_v3 = vpop.f32.mrb[46].mxu1  ;;  %v1271_v7 = vadd.f32 %v2882_v35, %v1270_v2 }
 0x384   : > { %v1282_v5 = vadd.f32 %v2127_v3, %v2882_v35  ;;  %v1273_v6 = vpop.f32.mrb[47].mxu1 }
 0x385   : > { %v1274_v8 = vadd.f32 %v2882_v35, %v1273_v6 }
 0x386   : > { %v1831_v9 = vpack.c.bf16 %v1282_v5, %v1279_v4 }
 0x387   : > { %v1826_v10 = vpack.c.bf16 %v1274_v8, %v1271_v7 }
 0x388   : > { %1879 = vst [vmem:[%s2890_s19 + $0x38] sm:$0xff] %v1831_v9  }
 0x389   : > { %1878 = vst [vmem:[%s2890_s19 + $0x30] sm:$0xff] %v1826_v10  }
 0x391   : > { %v2130_v11 = vpop.f32.mrb[48].mxu1 }
 0x392   : > { %v1286_v12 = vpop.f32.mrb[49].mxu1  ;;  %v1295_v14 = vadd.f32 %v2130_v11, %v2882_v35 }
 0x393   : > { %v2131_v13 = vpop.f32.mrb[50].mxu1  ;;  %v1287_v17 = vadd.f32 %v2882_v35, %v1286_v12 }
 0x394   : > { %v1298_v15 = vadd.f32 %v2131_v13, %v2882_v35  ;;  %v1289_v16 = vpop.f32.mrb[51].mxu1 }
 0x395   : > { %v1290_v18 = vadd.f32 %v2882_v35, %v1289_v16 }
 0x396   : > { %v1841_v19 = vpack.c.bf16 %v1298_v15, %v1295_v14 }
 0x397   : > { %v1836_v20 = vpack.c.bf16 %v1290_v18, %v1287_v17 }
 0x398   : > { %1881 = vst [vmem:[%s2890_s19 + $0x48] sm:$0xff] %v1841_v19  }
 0x399   : > { %1880 = vst [vmem:[%s2890_s19 + $0x40] sm:$0xff] %v1836_v20  }
 0x3a1   : > { %v2134_v21 = vpop.f32.mrb[52].mxu1 }
 0x3a2   : > { %v1302_v22 = vpop.f32.mrb[53].mxu1  ;;  %v1311_v24 = vadd.f32 %v2134_v21, %v2882_v35 }
 0x3a3   : > { %v2135_v23 = vpop.f32.mrb[54].mxu1  ;;  %v1303_v27 = vadd.f32 %v2882_v35, %v1302_v22 }
 0x3a4   : > { %v1314_v25 = vadd.f32 %v2135_v23, %v2882_v35  ;;  %v1305_v26 = vpop.f32.mrb[55].mxu1 }
 0x3a5   : > { %v1306_v28 = vadd.f32 %v2882_v35, %v1305_v26 }
 0x3a6   : > { %v1851_v29 = vpack.c.bf16 %v1314_v25, %v1311_v24 }
 0x3a7   : > { %v1846_v30 = vpack.c.bf16 %v1306_v28, %v1303_v27 }
 0x3a8   : > { %1883 = vst [vmem:[%s2890_s19 + $0x58] sm:$0xff] %v1851_v29  }
 0x3a9   : > { %1882 = vst [vmem:[%s2890_s19 + $0x50] sm:$0xff] %v1846_v30  }
 0x3b1   : > { %v2138_v31 = vpop.f32.mrb[56].mxu1 }
 0x3b2   : > { %v1318_v32 = vpop.f32.mrb[57].mxu1  ;;  %v1327_v34 = vadd.f32 %v2138_v31, %v2882_v35 }
 0x3b3   : > { %v2139_v33 = vpop.f32.mrb[58].mxu1  ;;  %v1319_v38 = vadd.f32 %v2882_v35, %v1318_v32 }
 0x3b4   : > { %v1330_v36 = vadd.f32 %v2139_v33, %v2882_v35  ;;  %v1321_v37 = vpop.f32.mrb[59].mxu1 }
 0x3b5   : > { %v1322_v48 = vadd.f32 %v2882_v35, %v1321_v37 }
 0x3b6   : > { %v1861_v39 = vpack.c.bf16 %v1330_v36, %v1327_v34 }
 0x3b7   : > { %v1856_v40 = vpack.c.bf16 %v1322_v48, %v1319_v38 }
 0x3b8   : > { %1885 = vst [vmem:[%s2890_s19 + $0x68] sm:$0xff] %v1861_v39  }
 0x3b9   : > { %1884 = vst [vmem:[%s2890_s19 + $0x60] sm:$0xff] %v1856_v40  }
 0x3c1   : > { %v2142_v41 = vpop.f32.mrb[60].mxu1 }
 0x3c2   : > { %v1334_v42 = vpop.f32.mrb[61].mxu1  ;;  %v1343_v44 = vadd.f32 %v2142_v41, %v2882_v35 }
 0x3c3   : > { %v2143_v43 = vpop.f32.mrb[62].mxu1  ;;  %v1335_v47 = vadd.f32 %v2882_v35, %v1334_v42 }
 0x3c4   : > { %v1346_v45 = vadd.f32 %v2143_v43, %v2882_v35  ;;  %v1337_v46 = vpop.f32.mrb[63].mxu1 }
 0x3c5   : > { %v1338_v49 = vadd.f32 %v2882_v35, %v1337_v46 }
 0x3c6   : > { %v1871_v50 = vpack.c.bf16 %v1346_v45, %v1343_v44 }
 0x3c7   : > { %v1866_v51 = vpack.c.bf16 %v1338_v49, %v1335_v47 }
 0x3c8   : > { %1887 = vst [vmem:[%s2890_s19 + $0x78] sm:$0xff] %v1871_v50  }
 0x3c9   : > { %1886 = vst [vmem:[%s2890_s19 + $0x70] sm:$0xff] %v1866_v51  }
 0x3ca   : > { %2431 = shalt.err (!%p2428_p7)
}
 0x3cb   : > { %s2432_s0 = scalar_lea.hbm %s2939_s11, 2048  ;;  %s2436_s18 = scalar_lea.hbm %s2993_s6, 4096 }
 0x3cc   : > { %p2433_p9 = scmp.ne.s32.totalorder %s2939_s11, %s2432_s0  ;;  %p2437_p11 = scmp.lt.u32.totalorder %s2939_s11, %s2993_s6 }
 0x3cd   : > { %p2438_p2 = scmp.lt.u32.totalorder %s2436_s18, %s2432_s0  ;;  %p2440_p1 = scmp.lt.u32.totalorder %s2432_s0, %s2939_s11 }
 0x3ce   : > { %p2434_p0 = pnand %p2433_p9, %p3021_p13 }
 0x3cf   : > { %p2439_p12 = por %p2438_p2, %p2437_p11 }
 0x3d0   : > { %p2435_p8 = pneg %p2434_p0 }
 0x3d1   : > { %p2441_p6 = por %p2440_p1, %p2439_p12 }
 0x3d3   : > { %p2442_p10 = pnand %p2441_p6, %p2435_p8 }
 0x3d5   : > { %2445 = shalt.err (!%p2442_p10)
}
 0x3d6   : > { %s2507_s17 = smov 64   ;;  %s2508_s30 = smov 4  }
 0x3d7   : > { %2156 = dma.vmem_to_hbm [thread:$0]  (%p3021_p13), %s2941_s26, 2048, %s2939_s11, %s1510_s25, %s2507_s17, %s2507_s17, %s2508_s30  }
 0x3d8 PF: > { %s1538_s19 = sand.u32 1, %s2484_s21   ;;  %p3022_p4 = scmp.ne.s32.totalorder %s3003_s28, 0 }
 0x3d9   : > { %p3023_p5 = scmp.ge.s32.totalorder %s2496_s24, 2  ;;  %s1539_s2 = scalar_lea.sflag [#allocation4], %s1538_s19 }
 0x3db   : > { %p2173_p3 = pnand %p3023_p5, %p3022_p4 }
 0x3dd   : > { %2479 = dma.done.wait (!%p2173_p3), %s1539_s2, 2048  }
 0x3de   : > { %2481 = vsyncadd (!%p2173_p3), %s1539_s2, 4294965248  ;;  %s3024_s14 = sld [smem:[#allocation16_spill]]  ;;  %p23_p7 = scmp.ge.s32.totalorder %s2660_s8, 4  }
 0x3df   : > { %s3025_s21 = smov %s2488_s22  ;;  %s3026_s22 = smov %s2492_s23 }
 0x3e0   : > { %s3028_s24 = smov %s2660_s8  ;;  %25 = sbr.rel (!%p23_p7) target bundleno = 12 (0xc), region = 110 }
 0x3e4   : > { %s3027_s23 = smov %s3024_s14 }
 0x3e7   :  { %1544 = vsyncpa [#allocation3], 1 }
 0x3e8   :  { %1546 = vsyncpa [#allocation3 + $0x1], 1 }
 0x3e9   :  { %1547 = vsyncpa [#allocation6], 1 }
 0x3ea   :  { %1549 = vsyncpa [#allocation6 + $0x1], 1 }
 0x3eb   :  { %1550 = vsyncpa [#allocation9], 1 }
 0x3ec   :  { %1551 = vsyncpa [#allocation4], 1 }
 0x3ed   :  { %1553 = vsyncpa [#allocation4 + $0x1], 1 }

</bundles_post_ra>
